<compile_context>
chip_gen: v7x
topology: tpu7x:2x2x1
jax: 0.10.0
libtpu: 0.0.40
codegen_flags: <defaults>
</compile_context>

<pallas_src>
import jax
import jax.numpy as jnp
from jax.experimental import pallas as pl
from jax.experimental.pallas import tpu as pltpu


def mlp_decision_kernel(x_ref, w1_ref, b1_ref, w2_ref, b2_ref, o_ref):
    # x_ref:  (1, input_dim)        VMEM  (already sliced to row 0)
    # w1_ref: (hidden, input_dim)   VMEM  (PyTorch Linear layout, no transpose)
    # b1_ref: (hidden, 1)           VMEM
    # w2_ref: (hidden, 1)           VMEM  (w2 reshaped column)
    # b2_ref: (1,)                  SMEM  (scalar)
    # o_ref:  (1, 1) int32          VMEM
    x0 = x_ref[...]                                            # (1, input_dim)

    # fc1 on VPU/XLU: broadcast-multiply + cross-lane reduce (no M=1 MXU matmul).
    h = jnp.sum(w1_ref[...] * x0, axis=-1, keepdims=True)      # (hidden, 1)
    h = jnp.maximum(h + b1_ref[...], 0.0)                      # bias + ReLU (VPU)

    # fc2: elementwise multiply + sublane reduce (output_dim == 1).
    y = jnp.sum(h * w2_ref[...], axis=0, keepdims=True)        # (1, 1)

    # Fused threshold with b2 folded in:  y + b2 > 0  <=>  y > -b2.
    o_ref[...] = (y > -b2_ref[0]).astype(jnp.int32)


def mlp_decision(x, w1, b1, w2, b2):
    """Fused MLP + threshold. Returns a (1, 1) int32 flag on device.

    Args:
      x:  (batch, input_dim) float32
      w1: (hidden_dim, input_dim) float32   (PyTorch Linear weight layout)
      b1: (hidden_dim,) float32
      w2: (output_dim, hidden_dim) float32  (output_dim must be 1)
      b2: (output_dim,) float32
    """
    batch, input_dim = x.shape
    hidden_dim, _ = w1.shape
    output_dim = w2.shape[0]
    assert output_dim == 1, "ModelMLP.forward's scalar-bool return needs output_dim == 1"

    x_row = x[0:1, :]                        # only row 0 feeds the decision -> 1-row DMA
    b1_col = b1.reshape(hidden_dim, 1)       # free metadata reshape
    w2_col = w2.reshape(hidden_dim, 1)       # (1, hidden) -> (hidden, 1), pure reshape
    b2_vec = b2.reshape(output_dim)          # scalar, goes to SMEM

    return pl.pallas_call(
        mlp_decision_kernel,
        out_shape=jax.ShapeDtypeStruct((1, 1), jnp.int32),
        in_specs=[
            pl.BlockSpec(memory_space=pltpu.MemorySpace.VMEM),   # x row 0
            pl.BlockSpec(memory_space=pltpu.MemorySpace.VMEM),   # w1 (PyTorch layout)
            pl.BlockSpec(memory_space=pltpu.MemorySpace.VMEM),   # b1 (hidden, 1)
            pl.BlockSpec(memory_space=pltpu.MemorySpace.VMEM),   # w2 (hidden, 1)
            pl.BlockSpec(memory_space=pltpu.MemorySpace.SMEM),   # b2 scalar
        ],
        out_specs=pl.BlockSpec(memory_space=pltpu.MemorySpace.VMEM),
        compiler_params=pltpu.CompilerParams(vmem_limit_bytes=32 * 1024 * 1024),
    )(x_row, w1, b1_col, w2_col, b2_vec)


@jax.jit
def model_mlp_forward_device(x, w1, b1, w2, b2):
    """Hot path: returns the (1, 1) int32 decision flag on device (no host sync)."""
    return mlp_decision(x, w1, b1, w2, b2)


def model_mlp_forward(x, w1, b1, w2, b2):
    """Reproduces ModelMLP.forward: True iff (fc2(relu(fc1(x))))[0] > 0.

    The Python-bool conversion (and its implicit device->host sync) is kept
    out of the jitted hot path; call model_mlp_forward_device in loops.
    """
    flag = model_mlp_forward_device(x, w1, b1, w2, b2)
    return bool(int(flag[0, 0]))


# TODO(synk): mutate_weights (host-side random weight mutation) is not a
# forward-pass op and is left unimplemented.

if __name__ == "__main__":
    # Small shapes consistent with the module: (batch, input_dim) input, two
    # Linear layers; output_dim must be 1 for the scalar-bool return.
    batch, input_dim, hidden_dim, output_dim = 2, 16, 32, 1

    key = jax.random.PRNGKey(0)
    kx, kw1, kb1, kw2, kb2 = jax.random.split(key, 5)

    x = jax.random.normal(kx, (batch, input_dim), dtype=jnp.float32)

    # initialize_weights(): uniform_(-1, 1) on both weight matrices.
    w1 = jax.random.uniform(kw1, (hidden_dim, input_dim),
                            minval=-1.0, maxval=1.0, dtype=jnp.float32)
    w2 = jax.random.uniform(kw2, (output_dim, hidden_dim),
                            minval=-1.0, maxval=1.0, dtype=jnp.float32)
    # Biases keep the PyTorch nn.Linear default init: U(-1/sqrt(fan_in), 1/sqrt(fan_in)).
    bnd1 = 1.0 / (input_dim ** 0.5)
    bnd2 = 1.0 / (hidden_dim ** 0.5)
    b1 = jax.random.uniform(kb1, (hidden_dim,), minval=-bnd1, maxval=bnd1,
                            dtype=jnp.float32)
    b2 = jax.random.uniform(kb2, (output_dim,), minval=-bnd2, maxval=bnd2,
                            dtype=jnp.float32)

    # Run the fused kernel once and block on the device result.
    flag = jax.block_until_ready(model_mlp_forward_device(x, w1, b1, w2, b2))
    result = bool(int(flag[0, 0]))
    assert isinstance(result, bool)

    # Cross-check against a pure-JAX reference of the module's forward.
    y_ref = jnp.maximum(x @ w1.T + b1, 0.0) @ w2.T + b2
    ref_result = bool(y_ref[0, 0] > 0)
    assert result == ref_result, (result, ref_result)

    print("KERNEL_OK")
</pallas_src>

<mosaic_0001>
module attributes {stable_mosaic.version = 11 : i64} {
  func.func @mlp_decision_kernel(%arg0: memref<1x16xf32, #tpu.memory_space<vmem>>, %arg1: memref<32x16xf32, #tpu.memory_space<vmem>>, %arg2: memref<32x1xf32, #tpu.memory_space<vmem>>, %arg3: memref<32x1xf32, #tpu.memory_space<vmem>>, %arg4: memref<1xf32, #tpu.memory_space<smem>>, %arg5: memref<1x1xi32, #tpu.memory_space<vmem>>) attributes {dimension_semantics = [], scalar_prefetch = 0 : i64, scratch_operands = 0 : i64, tpu.core_type = #tpu.core_type<tc>} {
    %c0 = arith.constant 0 : index
    %c0_0 = arith.constant 0 : index
    %0 = vector.load %arg0[%c0, %c0_0] : memref<1x16xf32, #tpu.memory_space<vmem>>, vector<1x16xf32>
    %c0_1 = arith.constant 0 : index
    %c0_2 = arith.constant 0 : index
    %1 = vector.load %arg1[%c0_1, %c0_2] : memref<32x16xf32, #tpu.memory_space<vmem>>, vector<32x16xf32>
    %2 = vector.broadcast %0 : vector<1x16xf32> to vector<32x16xf32>
    %3 = arith.mulf %1, %2 : vector<32x16xf32>
    %cst = arith.constant dense<0.000000e+00> : vector<32xf32>
    %4 = vector.multi_reduction <add>, %3, %cst [1] : vector<32x16xf32> to vector<32xf32>
    %5 = vector.shape_cast %4 : vector<32xf32> to vector<32x1xf32>
    %c0_3 = arith.constant 0 : index
    %c0_4 = arith.constant 0 : index
    %6 = vector.load %arg2[%c0_3, %c0_4] : memref<32x1xf32, #tpu.memory_space<vmem>>, vector<32x1xf32>
    %7 = arith.addf %5, %6 : vector<32x1xf32>
    %cst_5 = arith.constant 0.000000e+00 : f32
    %8 = vector.broadcast %cst_5 : f32 to vector<32x1xf32>
    %9 = arith.maximumf %7, %8 : vector<32x1xf32>
    %c0_6 = arith.constant 0 : index
    %c0_7 = arith.constant 0 : index
    %10 = vector.load %arg3[%c0_6, %c0_7] : memref<32x1xf32, #tpu.memory_space<vmem>>, vector<32x1xf32>
    %11 = arith.mulf %9, %10 : vector<32x1xf32>
    %cst_8 = arith.constant dense<0.000000e+00> : vector<1xf32>
    %12 = vector.multi_reduction <add>, %11, %cst_8 [0] : vector<32x1xf32> to vector<1xf32>
    %13 = vector.shape_cast %12 : vector<1xf32> to vector<1x1xf32>
    %c0_9 = arith.constant 0 : index
    %14 = memref.load %arg4[%c0_9] : memref<1xf32, #tpu.memory_space<smem>>
    %cst_10 = arith.constant 0.000000e+00 : f32
    %15 = arith.subf %cst_10, %14 : f32
    %16 = vector.broadcast %15 : f32 to vector<1x1xf32>
    %17 = arith.cmpf ogt, %13, %16 : vector<1x1xf32>
    %18 = arith.extui %17 : vector<1x1xi1> to vector<1x1xi32>
    %c0_11 = arith.constant 0 : index
    %c0_12 = arith.constant 0 : index
    %19 = vector.load %arg5[%c0_11, %c0_12] : memref<1x1xi32, #tpu.memory_space<vmem>>, vector<1x1xi32>
    tpu.vector_store %arg5[%c0_11, %c0_12], %18 {strides = array<i32>} : memref<1x1xi32, #tpu.memory_space<vmem>>, vector<1x1xi32>,
    return
  }
}

</mosaic_0001>

<bundles_post_ra>
// kernel: model_mlp_forward_device.1
= control target key start
LH: loop header
LB: loop body
LE: loop exit
PB: predicated region body
PF: predicated region fallthrough
CT: control target
= control target key end

     0   :  { %vm37_vm0 = vcmask 130048   ;;  %s218_s0 = inlined_call_operand.vmem [shape: f32[1,16], index: 0, kind: input, shape index: {}]   ;;  %s219_s1 = inlined_call_operand.vmem [shape: f32[32,16], index: 1, kind: input, shape index: {}]   ;;  %s220_s2 = inlined_call_operand.vmem [shape: f32[32,1], index: 2, kind: input, shape index: {}]   ;;  %s221_s3 = inlined_call_operand.vmem [shape: f32[32,1], index: 3, kind: input, shape index: {}]   ;;  %s222_s4 = inlined_call_operand.<no memory space> [shape: f32[1], index: 4, kind: input, shape index: {}]   ;;  %s223_s5 = inlined_call_operand.hbm [shape: s32[1,1], index: 5, kind: output, shape index: {}]  }
   0x1   :  { %v105_v0 = vld [vmem:[%s218_s0] ss:$0 sm:$0xff]  ;;  %v25_v2 = vld [vmem:[%s219_s1 + $0x10] sm:$0xff]  ;;  %v24_v5 = vld [vmem:[%s219_s1 + $0x8] sm:$0xff] }
   0x2   :  { %v23_v1 = vld [vmem:[%s219_s1] sm:$0xff]  ;;  %v35_v4 = vmul.f32 %v105_v0, %v25_v2  ;;  %v26_v6 = vld [vmem:[%s219_s1 + $0x18] sm:$0xff]  ;;  %v34_v7 = vmul.f32 %v105_v0, %v24_v5 }
   0x3   :  { %v33_v3 = vmul.f32 %v105_v0, %v23_v1  ;;  %v36_v8 = vmul.f32 %v105_v0, %v26_v6 }
   0x4   :  { %11 = vsyncpa [#allocation4], 0  ;;  %v44_v10 = vsel %vm37_vm0, %v35_v4, 0.0  ;;  %v41_v11 = vsel %vm37_vm0, %v34_v7, 0.0  ;;  %v50_v13 = vld [vmem:[%s220_s2] sm:$0xff]  ;;  %v52_v14 = vld [vmem:[%s220_s2 + $0x10] sm:$0xff] }
   0x5   :  { %v38_v9 = vsel %vm37_vm0, %v33_v3, 0.0  ;;  %45 = vadd.xlane.f32.xlu1 %v44_v10  ;;  %v47_v12 = vsel %vm37_vm0, %v36_v8, 0.0  ;;  %v51_v19 = vld [vmem:[%s220_s2 + $0x8] sm:$0xff]  ;;  %v53_v20 = vld [vmem:[%s220_s2 + $0x18] sm:$0xff]  ;;  %v62_v22 = vld [vmem:[%s221_s3] sm:$0xff]  ;;  %vm70_vm1 = vcmask 7168  }
   0x6   :  { %39 = vadd.xlane.f32.xlu0 %v38_v9  ;;  %v64_v28 = vld [vmem:[%s221_s3 + $0x10] sm:$0xff]  ;;  %v63_v29 = vld [vmem:[%s221_s3 + $0x8] sm:$0xff]  ;;  %v65_v30 = vld [vmem:[%s221_s3 + $0x18] sm:$0xff]  ;;  %s85_s3 = ssub.f32 0.0, %s222_s4  ;;  %s132_s18 = smov [#allocation3]   ;;  %vm89_vm2 = vcmask 0  }
   0x7   :  { %s97_s19 = sshll.u32 %s132_s18, 4  ;;  %v133_v51 = vmov 0   ;;  %s98_s19 = int_to_ptr.vmem [resolvable:$true] %s97_s19 }
   0x8   :  { %v86_v49 = vstv %s85_s3  ;;  %s108_s20 = scalar_lea.vmem %s98_s19, 16  ;;  %s112_s21 = scalar_lea.vmem %s98_s19, 32 }
   0x9   :  { %48 = vadd.xlane.f32.xlu1 %v47_v12  ;;  %p109_p0 = scmp.ne.s32.totalorder %s98_s19, %s108_s20  ;;  %p113_p1 = scmp.lt.s32.totalorder %s98_s19, %s98_s19 }
   0xa   :  { %42 = vadd.xlane.f32.xlu0 %v41_v11  ;;  %p114_p2 = scmp.lt.s32.totalorder %s112_s21, %s108_s20 }
   0xc   :  { %p115_p3 = por %p114_p2, %p113_p1 }
   0xe   :  { %p116_p4 = pnand %p115_p3, %p109_p0 }
  0x92   :  { %v46_v16 = vpop.xlane.xlu1 %45 }
  0x93   :  { %v40_v15 = vpop.xlane.xlu0 %39  ;;  %v56_v18 = vadd.f32 %v52_v14, %v46_v16 }
  0x94   :  { %v54_v17 = vadd.f32 %v50_v13, %v40_v15 }
  0x95   :  { %v60_v25 = vmax.f32 %v56_v18, 0.0 }
  0x96   :  { %v58_v21 = vmax.f32 %v54_v17, 0.0  ;;  %v49_v24 = vpop.xlane.xlu1 %48 }
  0x97   :  { %v43_v23 = vpop.xlane.xlu0 %42  ;;  %v57_v27 = vadd.f32 %v53_v20, %v49_v24  ;;  %v68_v34 = vmul.f32 %v64_v28, %v60_v25 }
  0x98   :  { %v55_v26 = vadd.f32 %v51_v19, %v43_v23  ;;  %v66_v31 = vmul.f32 %v62_v22, %v58_v21 }
  0x99   :  { %v61_v33 = vmax.f32 %v57_v27, 0.0  ;;  %v74_v40 = vsel %vm70_vm1, %v68_v34, 0.0 }
  0x9a   :  { %v59_v32 = vmax.f32 %v55_v26, 0.0  ;;  %v71_v37 = vsel %vm70_vm1, %v66_v31, 0.0 }
  0x9b   :  { %v69_v36 = vmul.f32 %v65_v30, %v61_v33 }
  0x9c   :  { %v67_v35 = vmul.f32 %v63_v29, %v59_v32 }
  0x9d   :  { %v76_v41 = vsel %vm70_vm1, %v69_v36, 0.0 }
  0x9e   :  { %v72_v38 = vsel %vm70_vm1, %v67_v35, 0.0 }
  0x9f   :  { %v73_v39 = vadd.f32 %v72_v38, %v71_v37 }
  0xa1   :  { %v75_v42 = vadd.f32 %v74_v40, %v73_v39 }
  0xa3   :  { %v77_v43 = vadd.f32 %v76_v41, %v75_v42 }
  0xa5   :  { %v78_v44 = vrot.slane %v77_v43, 4 }
  0xa7   :  { %v79_v45 = vadd.f32 %v78_v44, %v77_v43 }
  0xa9   :  { %v80_v46 = vrot.slane %v79_v45, 2 }
  0xab   :  { %v81_v47 = vadd.f32 %v80_v46, %v79_v45 }
  0xad   :  { %v82_v48 = vrot.slane %v81_v47, 1 }
  0xaf   :  { %v83_v50 = vadd.f32 %v82_v48, %v81_v47 }
  0xb1   :  { %vm87_vm3 = vcmp.gt.f32.partialorder %v83_v50, %v86_v49 }
  0xb2   :  { %v88_v52 = vsel %vm87_vm3, 1, %v133_v51 }
  0xb3   :  { %90 = vst.msk [vmem:[#allocation3] sm:$0x1] %vm89_vm2, %v88_v52 }
  0xb4   :  { %119 = shalt.err (!%p116_p4)
}
  0xb5   :  { %s120_s23 = scalar_lea.hbm %s223_s5, 16 }
  0xb6   :  { %p121_p5 = scmp.ne.s32.totalorder %s223_s5, %s120_s23  ;;  %p124_p6 = scmp.lt.u32.totalorder %s120_s23, %s223_s5 }
  0xb8   :  { %p126_p7 = pnand %p124_p6, %p121_p5 }
  0xba   :  { %129 = shalt.err (!%p126_p7)
}
  0xbb   :  { %100 = dma.vmem_to_hbm [thread:$0]  %s98_s19, 16, %s223_s5, [#allocation4]  }
  0xbc   :  { %130 = dma.done.wait [#allocation4], 16  }
  0xbd   :  { %131 = vsyncadd [#allocation4], 4294967280 }
  0xbe   :  { %104 = vsyncpa [#allocation4], 1 }

</bundles_post_ra>
